<compile_context>
chip_gen: v5e
topology: v5e:2x2
jax: 0.10.0
libtpu: 0.0.40
codegen_flags: <defaults>
</compile_context>

<pallas_src>
import math

import numpy as np
import jax
import jax.numpy as jnp
from jax import lax
from jax.experimental import pallas as pl
from jax.experimental.pallas import tpu as pltpu

F32 = jnp.float32
BF16 = jnp.bfloat16

TILE_VMEM_BUDGET = 16 * 1024 * 1024   # working-set budget for lane-tile selection
MAX_TN = 16384


def _choose_tn(HW, C, B, has_skip):
    """Lane (H*W) tile: as large as the VMEM budget allows, multiple of 128."""
    # double-buffered bytes per lane: x (C*4) + out (3*4) + optional skip (3*4)
    per_lane = 2 * (C * 4 + 3 * 4 + (3 * 4 if has_skip else 0))
    cap = (TILE_VMEM_BUDGET // per_lane) // 128 * 128
    cap = int(max(128, min(cap, MAX_TN)))
    if HW % 128 != 0:
        # tiny StyleGAN resolutions (4x4 / 8x8): full-extent lane block is legal.
        return HW
    tn = min(cap, HW)
    # keep >=2 spatial blocks when B == 1 so both v7x TensorCores get work
    if B == 1 and HW >= 256 and tn > HW // 2:
        tn = HW // 2
    return max(128, tn // 128 * 128)


def _footprint_bytes(C, tn, has_skip):
    per_lane = 2 * (C * 4 + 3 * 4 + (3 * 4 if has_skip else 0))
    small = 2 * (8 * C * 4 + C * 4 + 3 * 4)           # weight / style / bias blocks
    return per_lane * tn + small


# -------- Pallas kernel: fused modulated 1x1 conv (+bias, + optional skip) --------
#
# For demodulate=False, kernel_size=1:
#   out[b, o, hw] = sum_c (scale * W[o, c] * s[b, c]) * x[b, c, hw] + bias[o] (+ skip)
# Grid = (batch, spatial tile).  H*W is lane-dense on x, skip and out.

def _torgb_conv_kernel_noskip(w_ref, s_ref, x_ref, bias_ref, o_ref):
    w_mod = (w_ref[...] * s_ref[...]).astype(BF16)                 # (8, C)
    acc = jnp.dot(w_mod, x_ref[...].astype(BF16),                  # in-kernel VPU cast
                  preferred_element_type=jnp.float32)              # (8, tn) f32
    o_ref[...] = acc[:3, :] + bias_ref[...]


def _torgb_conv_kernel_skip(w_ref, s_ref, x_ref, bias_ref, skip_ref, o_ref):
    w_mod = (w_ref[...] * s_ref[...]).astype(BF16)                 # (8, C)
    acc = jnp.dot(w_mod, x_ref[...].astype(BF16),
                  preferred_element_type=jnp.float32)              # (8, tn) f32
    o_ref[...] = acc[:3, :] + bias_ref[...] + skip_ref[...]


def torgb_modconv(x, s, w_scaled, conv_bias, skip_up=None):
    """x:(B,C,H,W) f32, s:(B,C) f32 (modulation), w_scaled:(3,C) f32 (includes 1/sqrt(C)),
    conv_bias:(3,) f32, skip_up:(B,3,H,W) f32 or None  ->  (B,3,H,W) f32."""
    B, C, H, W = x.shape
    O = w_scaled.shape[0]                 # 3
    HW = H * W
    has_skip = skip_up is not None

    tn = _choose_tn(HW, C, B, has_skip)
    n_blk = pl.cdiv(HW, tn)
    footprint = _footprint_bytes(C, tn, has_skip)
    assert footprint < 48 * 1024 * 1024, (
        f"ToRGB tile footprint {footprint} B too large for VMEM (C={C}, HW={HW})")
    vmem_limit = int(max(4 << 20, min(48 << 20, footprint + footprint // 4 + (2 << 20))))

    x_r = x.reshape(B, C, HW)                                      # metadata reshape only
    w_p = jnp.pad(w_scaled.astype(F32), ((0, 8 - O), (0, 0)))      # (8, C), tiny constant
    s_p = s.astype(F32).reshape(B, 1, C)
    bias_p = conv_bias.astype(F32).reshape(O, 1)

    in_specs = [
        pl.BlockSpec((8, C), lambda b, n: (0, 0)),                 # shared scaled weight
        pl.BlockSpec((None, 1, C), lambda b, n: (b, 0, 0)),        # per-batch style
        pl.BlockSpec((None, C, tn), lambda b, n: (b, 0, n)),       # activations, f32
        pl.BlockSpec((O, 1), lambda b, n: (0, 0)),                 # bias
    ]
    inputs = [w_p, s_p, x_r, bias_p]
    if has_skip:
        sk = skip_up.reshape(B, O, HW).astype(F32)                 # unpadded 3 channels
        in_specs.append(pl.BlockSpec((None, O, tn), lambda b, n: (b, 0, n)))
        inputs.append(sk)
        kernel = _torgb_conv_kernel_skip
    else:
        kernel = _torgb_conv_kernel_noskip

    out = pl.pallas_call(
        kernel,
        out_shape=jax.ShapeDtypeStruct((B, O, HW), F32),
        grid_spec=pltpu.PrefetchScalarGridSpec(
            num_scalar_prefetch=0,
            grid=(B, n_blk),
            in_specs=in_specs,
            out_specs=pl.BlockSpec((None, O, tn), lambda b, n: (b, 0, n)),
        ),
        compiler_params=pltpu.CompilerParams(
            dimension_semantics=("parallel", "parallel"),
            vmem_limit_bytes=vmem_limit,
        ),
    )(*inputs)
    return out.reshape(B, O, H, W)


# ------------------------------- upfirdn2d upsample --------------------------------

def make_blur_kernel(k=(1.0, 3.0, 3.0, 1.0), factor=2):
    k = np.asarray(k, dtype=np.float32)
    k2 = np.outer(k, k)
    k2 = k2 / k2.sum()
    return jnp.asarray(k2 * (factor ** 2))


def upsample_upfirdn(x, k2d, factor=2):
    """upfirdn2d(up=2, pad=(pad0,pad1)) via lhs_dilation (no materialized zero-insert).
    TODO(synk): the 3-channel depthwise FIR is negligible work; left to XLA."""
    B, C, H, W = x.shape
    kh, _ = k2d.shape
    p = kh - factor
    pad0 = (p + 1) // 2 + factor - 1
    pad1 = p // 2
    w = jnp.tile(jnp.flip(k2d)[None, None], (C, 1, 1, 1))
    return lax.conv_general_dilated(
        x, w, (1, 1),
        ((pad0, pad1 + factor - 1), (pad0, pad1 + factor - 1)),
        lhs_dilation=(factor, factor),
        feature_group_count=C,
        dimension_numbers=("NCHW", "OIHW", "NCHW"),
        precision=lax.Precision.HIGHEST)


def upsample_upfirdn_explicit(x, k2d, factor=2):
    """Literal zero-insert + pad + FIR formulation (for cross-checking only)."""
    B, C, H, W = x.shape
    kh, kw = k2d.shape
    p = kh - factor
    pad0 = (p + 1) // 2 + factor - 1
    pad1 = p // 2
    z = jnp.zeros((B, C, H, factor, W, factor), x.dtype)
    z = z.at[:, :, :, 0, :, 0].set(x)
    z = z.reshape(B, C, H * factor, W * factor)
    z = jnp.pad(z, ((0, 0), (0, 0), (pad0, pad1), (pad0, pad1)))
    w = jnp.tile(jnp.flip(k2d)[None, None], (C, 1, 1, 1))
    return lax.conv_general_dilated(
        z, w, (1, 1), ((0, 0), (0, 0)),
        feature_group_count=C,
        dimension_numbers=("NCHW", "OIHW", "NCHW"),
        precision=lax.Precision.HIGHEST)


# ----------------------------------- parameters ------------------------------------

def build_torgb_params(key, in_channel, style_dim):
    k1, k2, k3 = jax.random.split(key, 3)
    return {
        # ModulatedConv2d.weight: torch.randn(1, 3, in_channel, 1, 1) -> stored (3, C)
        "conv_w": jax.random.normal(k1, (3, in_channel), dtype=F32),
        # EqualLinear(style_dim, in_channel, bias_init=1)
        "mod_w": jax.random.normal(k2, (in_channel, style_dim), dtype=F32),
        "mod_b": jnp.ones((in_channel,), F32),
        # ToRGB.bias is zeros in torch init; use small random values here so the
        # fused bias-add epilogue is actually exercised by the test.
        "bias": 0.1 * jax.random.normal(k3, (1, 3, 1, 1), dtype=F32),
    }


# -------------------------------- forward (Pallas) ---------------------------------

def torgb_forward(params, x, style, skip=None):
    B, C, H, W = x.shape
    style_dim = style.shape[1]
    blur_k = make_blur_kernel()
    # 1. modulation EqualLinear — microscopic ((B,style_dim)@(style_dim,C)); a
    #    dedicated pallas_call is pure launch overhead at these sizes, so plain jnp.
    mod_scale = 1.0 / math.sqrt(style_dim)
    s = jnp.dot(style, (params["mod_w"] * mod_scale).T,
                precision=lax.Precision.HIGHEST) + params["mod_b"]          # (B, C)
    # 2-4. fused modulated 1x1 conv + bias (+ upsampled skip) in one Pallas kernel
    conv_scale = 1.0 / math.sqrt(C)
    skip_up = upsample_upfirdn(skip, blur_k) if skip is not None else None
    return torgb_modconv(x, s, params["conv_w"] * conv_scale,
                         params["bias"].reshape(3), skip_up)


# ------------------------- pure-JAX f32 reference (checking) ------------------------

def torgb_forward_ref(params, x, style, skip=None):
    B, C, H, W = x.shape
    style_dim = style.shape[1]
    blur_k = make_blur_kernel()
    s = jnp.dot(style, (params["mod_w"] * (1.0 / math.sqrt(style_dim))).T,
                precision=lax.Precision.HIGHEST) + params["mod_b"]
    wmod = (1.0 / math.sqrt(C)) * params["conv_w"][None, :, :] * s[:, None, :]  # (B,3,C)
    out = jnp.einsum("boc,bchw->bohw", wmod, x, precision=lax.Precision.HIGHEST)
    out = out + params["bias"].reshape(1, 3, 1, 1)
    if skip is not None:
        out = out + upsample_upfirdn_explicit(skip, blur_k)
    return out


# --------------------------------------- main ---------------------------------------

if __name__ == "__main__":
    key = jax.random.PRNGKey(0)
    kp, kx, ks, kk = jax.random.split(key, 4)

    batch, in_channel, style_dim, H, W = 2, 64, 32, 16, 16
    params = build_torgb_params(kp, in_channel, style_dim)
    x = jax.random.normal(kx, (batch, in_channel, H, W), dtype=F32)
    style = jax.random.normal(ks, (batch, style_dim), dtype=F32)
    skip = jax.random.normal(kk, (batch, 3, H // 2, W // 2), dtype=F32)

    fwd = jax.jit(torgb_forward)

    out_noskip = jax.block_until_ready(fwd(params, x, style, None))
    out_skip = jax.block_until_ready(fwd(params, x, style, skip))
    assert out_noskip.shape == (batch, 3, H, W), out_noskip.shape
    assert out_skip.shape == (batch, 3, H, W), out_skip.shape

    ref_noskip = jax.block_until_ready(torgb_forward_ref(params, x, style, None))
    ref_skip = jax.block_until_ready(torgb_forward_ref(params, x, style, skip))

    def relerr(a, b):
        return float(jnp.linalg.norm(a - b) / jnp.maximum(jnp.linalg.norm(b), 1e-6))

    e1 = relerr(out_noskip, ref_noskip)
    e2 = relerr(out_skip, ref_skip)
    # bf16 MXU operands (cast in-kernel) with f32 accumulation vs a pure-f32 reference.
    assert e1 < 2e-2, f"no-skip mismatch: rel err {e1}"
    assert e2 < 2e-2, f"skip mismatch: rel err {e2}"

    print("KERNEL_OK")
</pallas_src>

<mosaic_0001>
module attributes {stable_mosaic.version = 11 : i64} {
  func.func @_torgb_conv_kernel_noskip(%arg0: i32, %arg1: i32, %arg2: memref<8x64xf32, #tpu.memory_space<vmem>>, %arg3: memref<1x1x64xf32, #tpu.memory_space<vmem>>, %arg4: memref<1x64x256xf32, #tpu.memory_space<vmem>>, %arg5: memref<3x1xf32, #tpu.memory_space<vmem>>, %arg6: memref<1x3x256xf32, #tpu.memory_space<vmem>>) attributes {dimension_semantics = [#tpu.dimension_semantics<parallel>, #tpu.dimension_semantics<parallel>], iteration_bounds = array<i64: 2, 1>, scalar_prefetch = 0 : i64, scratch_operands = 0 : i64, tpu.core_type = #tpu.core_type<tc>, window_params = [{pipeline_mode = #tpu.pipeline_mode<synchronous>, transform_indices = @transform_0, window_bounds = array<i64: 8, 64>}, {transform_indices = @transform_1, window_bounds = array<i64: 1, 1, 64>}, {transform_indices = @transform_2, window_bounds = array<i64: 1, 64, 256>}, {pipeline_mode = #tpu.pipeline_mode<synchronous>, transform_indices = @transform_3, window_bounds = array<i64: 3, 1>}, {transform_indices = @transform_4, window_bounds = array<i64: 1, 3, 256>}]} {
    %c0 = arith.constant 0 : index
    %c0_0 = arith.constant 0 : index
    %0 = vector.load %arg2[%c0, %c0_0] : memref<8x64xf32, #tpu.memory_space<vmem>>, vector<8x64xf32>
    %c0_1 = arith.constant 0 : index
    %c0_2 = arith.constant 0 : index
    %c0_3 = arith.constant 0 : index
    %1 = vector.load %arg3[%c0_1, %c0_2, %c0_3] : memref<1x1x64xf32, #tpu.memory_space<vmem>>, vector<1x1x64xf32>
    %2 = vector.shape_cast %1 : vector<1x1x64xf32> to vector<1x64xf32>
    %3 = vector.broadcast %2 : vector<1x64xf32> to vector<8x64xf32>
    %4 = arith.mulf %0, %3 : vector<8x64xf32>
    %5 = arith.truncf %4 : vector<8x64xf32> to vector<8x64xbf16>
    %c0_4 = arith.constant 0 : index
    %c0_5 = arith.constant 0 : index
    %c0_6 = arith.constant 0 : index
    %6 = vector.load %arg4[%c0_4, %c0_5, %c0_6] : memref<1x64x256xf32, #tpu.memory_space<vmem>>, vector<1x64x256xf32>
    %7 = vector.shape_cast %6 : vector<1x64x256xf32> to vector<64x256xf32>
    %8 = arith.truncf %7 : vector<64x256xf32> to vector<64x256xbf16>
    %cst = arith.constant dense<0.000000e+00> : vector<8x256xf32>
    %9 = tpu.matmul %5, %8, %cst {dimension_numbers = #tpu.dot_dimension_numbers<[1], [0], [0], [1], [0, 0, 1, 1], [], []>} : vector<8x64xbf16>, vector<64x256xbf16>, vector<8x256xf32> -> vector<8x256xf32>
    %10 = vector.extract_strided_slice %9 {offsets = [0, 0], sizes = [3, 256], strides = [1, 1]} : vector<8x256xf32> to vector<3x256xf32>
    %c0_7 = arith.constant 0 : index
    %c0_8 = arith.constant 0 : index
    %11 = vector.load %arg5[%c0_7, %c0_8] : memref<3x1xf32, #tpu.memory_space<vmem>>, vector<3x1xf32>
    %12 = vector.broadcast %11 : vector<3x1xf32> to vector<3x256xf32>
    %13 = arith.addf %10, %12 : vector<3x256xf32>
    %c0_9 = arith.constant 0 : index
    %c0_10 = arith.constant 0 : index
    %c0_11 = arith.constant 0 : index
    %14 = vector.load %arg6[%c0_9, %c0_10, %c0_11] : memref<1x3x256xf32, #tpu.memory_space<vmem>>, vector<1x3x256xf32>
    %15 = vector.shape_cast %14 : vector<1x3x256xf32> to vector<3x256xf32>
    %16 = vector.shape_cast %13 : vector<3x256xf32> to vector<1x3x256xf32>
    tpu.vector_store %arg6[%c0_9, %c0_10, %c0_11], %16 {strides = array<i32>} : memref<1x3x256xf32, #tpu.memory_space<vmem>>, vector<1x3x256xf32>,
    return
  }
  func.func @transform_0(%arg0: i32, %arg1: i32) -> (i32, i32) {
    %c0_i32 = arith.constant 0 : i32
    %c0_i32_0 = arith.constant 0 : i32
    %c0_i32_1 = arith.constant 0 : i32
    return %c0_i32, %c0_i32_0 : i32, i32
  }
  func.func @transform_1(%arg0: i32, %arg1: i32) -> (i32, i32, i32) {
    %c0_i32 = arith.constant 0 : i32
    %c0_i32_0 = arith.constant 0 : i32
    %c0_i32_1 = arith.constant 0 : i32
    return %arg0, %c0_i32, %c0_i32_0 : i32, i32, i32
  }
  func.func @transform_2(%arg0: i32, %arg1: i32) -> (i32, i32, i32) {
    %c0_i32 = arith.constant 0 : i32
    %c0_i32_0 = arith.constant 0 : i32
    return %arg0, %c0_i32, %arg1 : i32, i32, i32
  }
  func.func @transform_3(%arg0: i32, %arg1: i32) -> (i32, i32) {
    %c0_i32 = arith.constant 0 : i32
    %c0_i32_0 = arith.constant 0 : i32
    %c0_i32_1 = arith.constant 0 : i32
    return %c0_i32, %c0_i32_0 : i32, i32
  }
  func.func @transform_4(%arg0: i32, %arg1: i32) -> (i32, i32, i32) {
    %c0_i32 = arith.constant 0 : i32
    %c0_i32_0 = arith.constant 0 : i32
    return %arg0, %c0_i32, %arg1 : i32, i32, i32
  }
}

</mosaic_0001>

<bundles_post_ra>
// kernel: torgb_forward.1
= control target key start
LH: loop header
LB: loop body
LE: loop exit
PB: predicated region body
PF: predicated region fallthrough
CT: control target
= control target key end

     0   :  { %s516_s15 = smov 0   ;;  %s518_s16 = smov 0   ;;  %s563_s0 = inlined_call_operand.vmem [shape: f32[8,64], index: 0, kind: input, shape index: {}]   ;;  %s564_s1 = inlined_call_operand.vmem [shape: f32[2,1,64], index: 1, kind: input, shape index: {}]   ;;  %s565_s2 = inlined_call_operand.vmem [shape: f32[2,64,256], index: 2, kind: input, shape index: {}]   ;;  %s566_s3 = inlined_call_operand.vmem [shape: f32[3,1], index: 3, kind: input, shape index: {}]   ;;  %s567_s4 = inlined_call_operand.vmem [shape: f32[2,3,256], index: 4, kind: output, shape index: {}]  }
   0x1   :  { %s520_s17 = smov 0  }
   0x2 LB: > { %s26_s18 = sadd.s32 1, %s484_s16  ;;  %p428_p0 = scmp.ge.s32.totalorder %s488_s17, 1  ;;  %s488_s17 = sphi %s520_s17, %s14_s17   ;;  %s484_s16 = sphi %s518_s16, %s569_s16   ;;  %s480_s15 = sphi %s516_s15, %s568_s15  }
   0x3   : > { %p28_p1 = scmp.ge.s32.totalorder %s26_s18, 2  ;;  %p191_p2 = scmp.lt.s32.totalorder %s488_s17, 3 }
   0x5   : > { %s571_s18 = smov (%p28_p1, %s26_s18), 0  ;;  %p192_p3 = pnand %p428_p0, %p191_p2 }
   0x6   : > { %p228_p4 = scmp.lt.s32.totalorder (!%p192_p3), %s480_s15, 1 }
   0x7   : > { %195 = sbr.rel (%p192_p3) target bundleno = 168 (0xa8), region = 36 }
   0xc   : > { %v313_v0 = vld [vmem:[%s566_s3] sm:$0x7]  ;;  %v490_v1 = vmov 0   ;;  %s573_s15 = smov (!%p228_p4, %s480_s15), 1  ;;  %vm283_vm0 = vcmask 523264   ;;  %vm324_vm1 = vcmask 1043456  }
   0xd   : > { %464 = vset.pattern.permute.xlu0 %v490_v1  ;;  %s437_s21 = sshll.u32 %s573_s15, 7  ;;  %s230_s24 = scalar_lea.vmem %s564_s1, %s573_s15  ;;  %v252_v20 = vld [vmem:[%s563_s0] sm:$0xff] }
   0xe   : > { %316 = vperm.xlu0 %464, %v313_v0   ;;  %s239_s27 = scalar_lea.vmem %s565_s2, %s437_s21  ;;  %v465_v18 = vld [vmem:[%s230_s24] ss:$0 sm:$0xff]  ;;  %s438_s30 = sshll.u32 %s573_s15, 3 }
   0xf   : > { %v271_v2 = vld [vmem:[%s239_s27 + $0x60] sm:$0xff]  ;;  %v273_v3 = vld [vmem:[%s239_s27 + $0x70] sm:$0xff]  ;;  %v272_v4 = vld [vmem:[%s239_s27 + $0x68] sm:$0xff]  ;;  %v257_v26 = vmul.f32 %v465_v18, %v252_v20  ;;  %s249_s7 = scalar_lea.vmem %s567_s4, %s438_s30 }
  0x10   : > { %v281_v5 = vpack.c.bf16 %v273_v3, %v271_v2  ;;  %v274_v6 = vld [vmem:[%s239_s27 + $0x78] sm:$0xff]  ;;  %v267_v7 = vld [vmem:[%s239_s27 + $0x40] sm:$0xff]  ;;  %v269_v8 = vld [vmem:[%s239_s27 + $0x50] sm:$0xff] }
  0x11   : > { %v282_v9 = vpack.c.bf16 %v274_v6, %v272_v4  ;;  %v268_v10 = vld [vmem:[%s239_s27 + $0x48] sm:$0xff]  ;;  %v270_v11 = vld [vmem:[%s239_s27 + $0x58] sm:$0xff]  ;;  %v279_v12 = vpack.c.bf16 %v269_v8, %v267_v7  ;;  %v263_v14 = vld [vmem:[%s239_s27 + $0x20] sm:$0xff]  ;;  %v258_v29 = vpack.c.bf16 %v257_v26, %v257_v26 }
  0x12   : > { %291 = vmatpush.bf16.msra.mxu0 %v281_v5  ;;  %v280_v13 = vpack.c.bf16 %v270_v11, %v268_v10  ;;  %v265_v15 = vld [vmem:[%s239_s27 + $0x30] sm:$0xff]  ;;  %v264_v16 = vld [vmem:[%s239_s27 + $0x28] sm:$0xff]  ;;  %v266_v17 = vld [vmem:[%s239_s27 + $0x38] sm:$0xff] }
  0x13   : > { %304 = vmatpush.bf16.msra.mxu1 %v282_v9  ;;  %v277_v19 = vpack.c.bf16 %v265_v15, %v263_v14  ;;  %v278_v21 = vpack.c.bf16 %v266_v17, %v264_v16  ;;  %v259_v22 = vld [vmem:[%s239_s27] sm:$0xff]  ;;  %v261_v23 = vld [vmem:[%s239_s27 + $0x10] sm:$0xff]  ;;  %v260_v24 = vld [vmem:[%s239_s27 + $0x8] sm:$0xff] }
  0x14   : > { %v262_v25 = vld [vmem:[%s239_s27 + $0x18] sm:$0xff]  ;;  %v275_v27 = vpack.c.bf16 %v261_v23, %v259_v22 }
  0x15   : > { %v276_v28 = vpack.c.bf16 %v262_v25, %v260_v24 }
  0x16   : > { %292 = vmatpush.bf16.msra.mxu0 %v279_v12 }
  0x17   : > { %305 = vmatpush.bf16.msra.mxu1 %v280_v13 }
  0x1a   : > { %293 = vmatpush.bf16.msra.mxu0 %v277_v19 }
  0x1b   : > { %306 = vmatpush.bf16.msra.mxu1 %v278_v21 }
  0x1e   : > { %294 = vmatpush.bf16.msra.mxu0 %v275_v27 }
  0x1f   : > { %307 = vmatpush.bf16.msra.mxu1 %v276_v28 }
  0x21   : > { %433 = vmatmul.msk.bf16.vlgmr.msra.gmra.mxu0 %vm283_vm0, %v258_v29 }
  0x22   : > { %434 = vmatmul.msk.bf16.vlgmr.msra.gmra.mxu1 %vm283_vm0, %v258_v29 }
  0x80   : > { %v317_v30 = vpop.permute.xlu0 %316 }
  0x9e   : > { %v296_v31 = vpop.f32.mrf.mxu0 }
  0x9f   : > { %v309_v32 = vpop.f32.mrf.mxu1  ;;  %v319_v34 = vadd.f32 %v317_v30, %v296_v31 }
  0xa0   : > { %v320_v33 = vadd.f32 %v317_v30, %v309_v32 }
  0xa2   : > { %v323_v35 = vrot.slane %v320_v33, 4 }
  0xa4   : > { %v325_v36 = vsel %vm324_vm1, %v319_v34, %v323_v35 }
  0xa5   : > { %327 = vst [vmem:[%s249_s7] sm:$0x77] %v325_v36 }
  0xa6   : > { %v298_v37 = vpop.f32.mrf.mxu0 }
  0xa7   : > { %v311_v38 = vpop.f32.mrf.mxu1 }
  0xa8 PF: > { %s14_s17 = sadd.s32 1, %s488_s17   ;;  %s568_s15 = smov %s484_s16 }
  0xa9   : > { %p11_p5 = scmp.ge.s32.totalorder %s14_s17, 4   ;;  %s569_s16 = smov %s571_s18 }
  0xab   :  { %13 = sbr.rel (!%p11_p5) target bundleno = 2 (0x2), region = 69 }

</bundles_post_ra>
